<compile_context>
chip_gen: v7x
topology: tpu7x:2x2x1
jax: 0.10.0
libtpu: 0.0.40
codegen_flags: <defaults>
</compile_context>

<pallas_src>
import jax
import jax.numpy as jnp
from jax.experimental import pallas as pl
from jax.experimental.pallas import tpu as pltpu


def qfunc_kernel(obs_ref, act_ref, w1o_ref, w1a_ref, b1_ref,
                 w2_ref, b2_ref, w3_ref, b3_ref, o_ref):
    # bf16 operands into the MXU, fp32 accumulation via preferred_element_type.
    obs_b = obs_ref[...].astype(jnp.bfloat16)            # (TB, obs_dim)
    act_b = act_ref[...].astype(jnp.bfloat16)            # (TB, act_dim)

    # layer 1: fused concat -> two matmuls on the split W1; bias/ReLU in fp32
    h1 = (jnp.dot(obs_b, w1o_ref[...], preferred_element_type=jnp.float32)
          + jnp.dot(act_b, w1a_ref[...], preferred_element_type=jnp.float32)
          + b1_ref[...])
    h1 = jnp.maximum(h1, 0.0)                            # (TB, H1) f32

    # layer 2
    h2 = jnp.dot(h1.astype(jnp.bfloat16), w2_ref[...],
                 preferred_element_type=jnp.float32) + b2_ref[...]
    h2 = jnp.maximum(h2, 0.0)                            # (TB, H2) f32

    # output layer (out_features = 1): VPU multiply + lane reduce, no MXU pass
    q = jnp.sum(h2 * w3_ref[...], axis=-1)               # (TB,) f32
    # lane-dense (1, TB) store: batch sits on the 128-lane axis
    o_ref[...] = jnp.reshape(q, (1, -1)) + b3_ref[...]


def init_mlp_q_params(key, obs_dim, act_dim, hidden):
    """Deterministic init mimicking torch.nn.Linear (uniform +/- 1/sqrt(fan_in)),
    stored in the kernel's layout: (in, out) weights, W1 split by obs/act,
    matmul weights in bf16, final-layer weight as a (1, H2) fp32 row."""
    h1, h2 = hidden
    din = obs_dim + act_dim
    k1, k2, k3 = jax.random.split(key, 3)

    def linear(k, fan_in, fan_out):
        kw, kb = jax.random.split(k)
        bound = 1.0 / (fan_in ** 0.5)
        w = jax.random.uniform(kw, (fan_in, fan_out), jnp.float32, -bound, bound)
        b = jax.random.uniform(kb, (1, fan_out), jnp.float32, -bound, bound)
        return w, b

    w1, b1 = linear(k1, din, h1)
    w2, b2 = linear(k2, h1, h2)
    w3, b3 = linear(k3, h2, 1)

    w1o = w1[:obs_dim].astype(jnp.bfloat16)   # (obs_dim, H1) bf16
    w1a = w1[obs_dim:].astype(jnp.bfloat16)   # (act_dim, H1) bf16
    w2b = w2.astype(jnp.bfloat16)             # (H1, H2)     bf16
    w3_row = w3.T                             # (1, H2)      f32 (used on VPU)
    return (w1o, w1a, b1), (w2b, b2), (w3_row, b3)


def _pick_batch_tile(B):
    # Only grid when the batch is large enough to amortize per-step overhead.
    for t in (256, 128):
        if B % t == 0 and B // t >= 2:
            return t
    return None


def mlp_q_function(obs, act, params):
    """obs: (B, obs_dim), act: (B, act_dim) -> q: (B,)"""
    (w1o, w1a, b1), (w2, b2), (w3_row, b3) = params
    obs = obs.astype(jnp.float32)
    act = act.astype(jnp.float32)
    B, obs_dim = obs.shape
    act_dim = act.shape[1]
    h1 = w1o.shape[1]
    h2 = w2.shape[1]

    args = (obs, act, w1o, w1a, b1, w2, b2, w3_row, b3)
    out_shape = jax.ShapeDtypeStruct((1, B), jnp.float32)   # lane-dense q

    tile_b = _pick_batch_tile(B)
    if tile_b is None:
        # Small batch: whole problem in VMEM, single program, no grid.
        q2d = pl.pallas_call(
            qfunc_kernel,
            out_shape=out_shape,
            in_specs=[pl.BlockSpec(memory_space=pltpu.VMEM)] * len(args),
            out_specs=pl.BlockSpec(memory_space=pltpu.VMEM),
        )(*args)
    else:
        # Large batch: 1-D grid over batch tiles; weights are grid-invariant.
        q2d = pl.pallas_call(
            qfunc_kernel,
            out_shape=out_shape,
            grid_spec=pltpu.PrefetchScalarGridSpec(
                num_scalar_prefetch=0,
                grid=(B // tile_b,),
                in_specs=[
                    pl.BlockSpec((tile_b, obs_dim), lambda i: (i, 0)),  # obs
                    pl.BlockSpec((tile_b, act_dim), lambda i: (i, 0)),  # act
                    pl.BlockSpec((obs_dim, h1), lambda i: (0, 0)),      # w1o
                    pl.BlockSpec((act_dim, h1), lambda i: (0, 0)),      # w1a
                    pl.BlockSpec((1, h1), lambda i: (0, 0)),            # b1
                    pl.BlockSpec((h1, h2), lambda i: (0, 0)),           # w2
                    pl.BlockSpec((1, h2), lambda i: (0, 0)),            # b2
                    pl.BlockSpec((1, h2), lambda i: (0, 0)),            # w3 row
                    pl.BlockSpec((1, 1), lambda i: (0, 0)),             # b3
                ],
                out_specs=pl.BlockSpec((1, tile_b), lambda i: (0, i)),
            ),
            compiler_params=pltpu.CompilerParams(
                dimension_semantics=("parallel",)),   # v7x: both TensorCores
        )(*args)

    # torch.squeeze(q, -1) equivalent: drop the leading singleton row.
    return q2d[0]


def reference_q(obs, act, params):
    """Pure-JAX mirror of the kernel math (same bf16 operands, fp32 accum)."""
    (w1o, w1a, b1), (w2, b2), (w3_row, b3) = params
    obs_b = obs.astype(jnp.bfloat16)
    act_b = act.astype(jnp.bfloat16)
    h1 = (jnp.dot(obs_b, w1o, preferred_element_type=jnp.float32)
          + jnp.dot(act_b, w1a, preferred_element_type=jnp.float32) + b1)
    h1 = jnp.maximum(h1, 0.0)
    h2 = jnp.dot(h1.astype(jnp.bfloat16), w2,
                 preferred_element_type=jnp.float32) + b2
    h2 = jnp.maximum(h2, 0.0)
    return jnp.sum(h2 * w3_row, axis=-1) + b3[0, 0]


if __name__ == "__main__":
    # Small shapes consistent with the module: obs_dim=12, act_dim=4,
    # hidden_sizes=(32, 32), batch=8.
    B, obs_dim, act_dim = 8, 12, 4
    hidden = (32, 32)

    key = jax.random.PRNGKey(0)
    k_obs, k_act, k_par, k_obs2, k_act2 = jax.random.split(key, 5)

    params = init_mlp_q_params(k_par, obs_dim, act_dim, hidden)

    # --- small batch: single-program path -----------------------------------
    obs = jax.random.normal(k_obs, (B, obs_dim), jnp.float32)
    act = jax.random.normal(k_act, (B, act_dim), jnp.float32)
    q = jax.block_until_ready(mlp_q_function(obs, act, params))
    q_ref = reference_q(obs, act, params)
    assert q.shape == (B,)
    assert jnp.allclose(q, q_ref, atol=5e-4, rtol=5e-4)

    # --- larger batch: gridded, lane-dense, megacore-parallel path ----------
    B2 = 512
    obs2 = jax.random.normal(k_obs2, (B2, obs_dim), jnp.float32)
    act2 = jax.random.normal(k_act2, (B2, act_dim), jnp.float32)
    q2 = jax.block_until_ready(mlp_q_function(obs2, act2, params))
    q2_ref = reference_q(obs2, act2, params)
    assert q2.shape == (B2,)
    assert jnp.allclose(q2, q2_ref, atol=5e-4, rtol=5e-4)

    print("KERNEL_OK")
</pallas_src>

<mosaic_0001>
module attributes {stable_mosaic.version = 11 : i64} {
  func.func @qfunc_kernel(%arg0: memref<8x12xf32, #tpu.memory_space<vmem>>, %arg1: memref<8x4xf32, #tpu.memory_space<vmem>>, %arg2: memref<12x32xbf16, #tpu.memory_space<vmem>>, %arg3: memref<4x32xbf16, #tpu.memory_space<vmem>>, %arg4: memref<1x32xf32, #tpu.memory_space<vmem>>, %arg5: memref<32x32xbf16, #tpu.memory_space<vmem>>, %arg6: memref<1x32xf32, #tpu.memory_space<vmem>>, %arg7: memref<1x32xf32, #tpu.memory_space<vmem>>, %arg8: memref<1x1xf32, #tpu.memory_space<vmem>>, %arg9: memref<1x8xf32, #tpu.memory_space<vmem>>) attributes {dimension_semantics = [], scalar_prefetch = 0 : i64, scratch_operands = 0 : i64, tpu.core_type = #tpu.core_type<tc>} {
    %c0 = arith.constant 0 : index
    %c0_0 = arith.constant 0 : index
    %0 = vector.load %arg0[%c0, %c0_0] : memref<8x12xf32, #tpu.memory_space<vmem>>, vector<8x12xf32>
    %1 = arith.truncf %0 : vector<8x12xf32> to vector<8x12xbf16>
    %c0_1 = arith.constant 0 : index
    %c0_2 = arith.constant 0 : index
    %2 = vector.load %arg1[%c0_1, %c0_2] : memref<8x4xf32, #tpu.memory_space<vmem>>, vector<8x4xf32>
    %3 = arith.truncf %2 : vector<8x4xf32> to vector<8x4xbf16>
    %c0_3 = arith.constant 0 : index
    %c0_4 = arith.constant 0 : index
    %4 = vector.load %arg2[%c0_3, %c0_4] : memref<12x32xbf16, #tpu.memory_space<vmem>>, vector<12x32xbf16>
    %cst = arith.constant dense<0.000000e+00> : vector<8x32xf32>
    %5 = tpu.matmul %1, %4, %cst {dimension_numbers = #tpu.dot_dimension_numbers<[1], [0], [0], [1], [0, 0, 1, 1], [], []>} : vector<8x12xbf16>, vector<12x32xbf16>, vector<8x32xf32> -> vector<8x32xf32>
    %c0_5 = arith.constant 0 : index
    %c0_6 = arith.constant 0 : index
    %6 = vector.load %arg3[%c0_5, %c0_6] : memref<4x32xbf16, #tpu.memory_space<vmem>>, vector<4x32xbf16>
    %cst_7 = arith.constant dense<0.000000e+00> : vector<8x32xf32>
    %7 = tpu.matmul %3, %6, %cst_7 {dimension_numbers = #tpu.dot_dimension_numbers<[1], [0], [0], [1], [0, 0, 1, 1], [], []>} : vector<8x4xbf16>, vector<4x32xbf16>, vector<8x32xf32> -> vector<8x32xf32>
    %8 = arith.addf %5, %7 : vector<8x32xf32>
    %c0_8 = arith.constant 0 : index
    %c0_9 = arith.constant 0 : index
    %9 = vector.load %arg4[%c0_8, %c0_9] : memref<1x32xf32, #tpu.memory_space<vmem>>, vector<1x32xf32>
    %10 = vector.broadcast %9 : vector<1x32xf32> to vector<8x32xf32>
    %11 = arith.addf %8, %10 : vector<8x32xf32>
    %cst_10 = arith.constant 0.000000e+00 : f32
    %12 = vector.broadcast %cst_10 : f32 to vector<8x32xf32>
    %13 = arith.maximumf %11, %12 : vector<8x32xf32>
    %14 = arith.truncf %13 : vector<8x32xf32> to vector<8x32xbf16>
    %c0_11 = arith.constant 0 : index
    %c0_12 = arith.constant 0 : index
    %15 = vector.load %arg5[%c0_11, %c0_12] : memref<32x32xbf16, #tpu.memory_space<vmem>>, vector<32x32xbf16>
    %cst_13 = arith.constant dense<0.000000e+00> : vector<8x32xf32>
    %16 = tpu.matmul %14, %15, %cst_13 {dimension_numbers = #tpu.dot_dimension_numbers<[1], [0], [0], [1], [0, 0, 1, 1], [], []>} : vector<8x32xbf16>, vector<32x32xbf16>, vector<8x32xf32> -> vector<8x32xf32>
    %c0_14 = arith.constant 0 : index
    %c0_15 = arith.constant 0 : index
    %17 = vector.load %arg6[%c0_14, %c0_15] : memref<1x32xf32, #tpu.memory_space<vmem>>, vector<1x32xf32>
    %18 = vector.broadcast %17 : vector<1x32xf32> to vector<8x32xf32>
    %19 = arith.addf %16, %18 : vector<8x32xf32>
    %cst_16 = arith.constant 0.000000e+00 : f32
    %20 = vector.broadcast %cst_16 : f32 to vector<8x32xf32>
    %21 = arith.maximumf %19, %20 : vector<8x32xf32>
    %c0_17 = arith.constant 0 : index
    %c0_18 = arith.constant 0 : index
    %22 = vector.load %arg7[%c0_17, %c0_18] : memref<1x32xf32, #tpu.memory_space<vmem>>, vector<1x32xf32>
    %23 = vector.broadcast %22 : vector<1x32xf32> to vector<8x32xf32>
    %24 = arith.mulf %21, %23 : vector<8x32xf32>
    %cst_19 = arith.constant dense<0.000000e+00> : vector<8xf32>
    %25 = vector.multi_reduction <add>, %24, %cst_19 [1] : vector<8x32xf32> to vector<8xf32>
    %26 = vector.shape_cast %25 : vector<8xf32> to vector<1x8xf32>
    %c0_20 = arith.constant 0 : index
    %c0_21 = arith.constant 0 : index
    %27 = vector.load %arg8[%c0_20, %c0_21] : memref<1x1xf32, #tpu.memory_space<vmem>>, vector<1x1xf32>
    %28 = vector.broadcast %27 : vector<1x1xf32> to vector<1x8xf32>
    %29 = arith.addf %26, %28 : vector<1x8xf32>
    %c0_22 = arith.constant 0 : index
    %c0_23 = arith.constant 0 : index
    %30 = vector.load %arg9[%c0_22, %c0_23] : memref<1x8xf32, #tpu.memory_space<vmem>>, vector<1x8xf32>
    tpu.vector_store %arg9[%c0_22, %c0_23], %29 {strides = array<i32>} : memref<1x8xf32, #tpu.memory_space<vmem>>, vector<1x8xf32>,
    return
  }
}

</mosaic_0001>

<bundles_post_ra>
// kernel: tpu_custom_call.1
= control target key start
LH: loop header
LB: loop body
LE: loop exit
PB: predicated region body
PF: predicated region fallthrough
CT: control target
= control target key end

     0   :  { %s489_s0 = inlined_call_operand.vmem [shape: f32[8,12], index: 0, kind: input, shape index: {}]   ;;  %s490_s1 = inlined_call_operand.vmem [shape: f32[8,4], index: 1, kind: input, shape index: {}]   ;;  %s491_s2 = inlined_call_operand.hbm [shape: bf16[12,32], index: 2, kind: input, shape index: {}]   ;;  %s492_s3 = inlined_call_operand.vmem [shape: bf16[4,32], index: 3, kind: input, shape index: {}]   ;;  %s493_s4 = inlined_call_operand.vmem [shape: f32[1,32], index: 4, kind: input, shape index: {}]   ;;  %s494_s5 = inlined_call_operand.vmem [shape: bf16[32,32], index: 5, kind: input, shape index: {}]   ;;  %s495_s6 = inlined_call_operand.vmem [shape: f32[1,32], index: 6, kind: input, shape index: {}]   ;;  %s496_s7 = inlined_call_operand.vmem [shape: f32[1,32], index: 7, kind: input, shape index: {}]   ;;  %s497_s8 = inlined_call_operand.<no memory space> [shape: f32[1,1], index: 8, kind: input, shape index: {}]   ;;  %s498_s9 = inlined_call_operand.hbm [shape: f32[1,8], index: 9, kind: output, shape index: {}]  }
   0x1   :  { %v14_v0 = vstv %s497_s8 }
   0x2   :  { %15 = vst [vmem:[#allocation2] sm:$0x1] %v14_v0 }
   0x3   :  { %16 = vsyncpa [#allocation4], 0 }
   0x4   :  { %17 = vsyncpa [#allocation5], 0  ;;  %s378_s11 = smov [#allocation3]   ;;  %s330_s15 = scalar_lea.hbm %s491_s2, 128 }
   0x5   :  { %s27_s12 = sshll.u32 %s378_s11, 4  ;;  %p331_p0 = scmp.ne.s32.totalorder %s491_s2, %s330_s15  ;;  %s28_s12 = int_to_ptr.vmem [resolvable:$true] %s27_s12 }
   0x6   :  { %p334_p1 = scmp.lt.u32.totalorder %s330_s15, %s491_s2 }
   0x8   :  { %p336_p2 = pnand %p334_p1, %p331_p0 }
   0xa   :  { %339 = shalt.err (!%p336_p2)
}
   0xb   :  { %s340_s8 = scalar_lea.vmem %s28_s12, 128  ;;  %p345_p4 = scmp.lt.s32.totalorder %s28_s12, %s28_s12 }
   0xc   :  { %p341_p3 = scmp.ne.s32.totalorder %s28_s12, %s340_s8  ;;  %p346_p5 = scmp.lt.s32.totalorder %s340_s8, %s340_s8 }
   0xe   :  { %p347_p6 = por %p346_p5, %p345_p4 }
  0x10   :  { %p348_p7 = pnand %p347_p6, %p341_p3 }
  0x12   :  { %351 = shalt.err (!%p348_p7)
}
  0x13   :  { %s379_s20 = smov 64   ;;  %s380_s21 = smov 4  }
  0x14   :  { %33 = dma.hbm_to_vmem [thread:$0]  %s491_s2, 128, %s28_s12, [#allocation4], %s379_s20, %s379_s20, %s380_s21  }
  0x15   :  { %374 = dma.done.wait [#allocation4], 128  }
  0x16   :  { %375 = vsyncadd [#allocation4], 4294967168  ;;  %v381_v1 = vmov 0.0   ;;  %vm382_vm0 = vmmov 0   ;;  %vm61_vm1 = vcmask 1041408   ;;  %vm114_vm2 = vcmask 1045504  }
  0x17   :  { %299 = vmatprep.subr.bf16.mxu0 %v381_v1  ;;  %305 = vmatprep.subr.bf16.mxu1 %v381_v1  ;;  %v56_v2 = vld [vmem:[%s492_s3] sm:$0x3]  ;;  %vm57_vm3 = vcmask 31744   ;;  %vm110_vm4 = vcmask 97280   ;;  %v329_v11 = vld [vmem:[%s494_s5 + $0x8] sm:$0xff]   ;;  %vm191_vm5 = vcmask 261120   ;;  %v253_v37 = vlaneseq }
  0x18   :  { %301 = vmatprep.mubr.msk.bf16.mxu0 %vm382_vm0, %v381_v1  ;;  %307 = vmatprep.mubr.msk.bf16.mxu1 %vm382_vm0, %v381_v1  ;;  %v63_v3 = vsel %vm61_vm1, %v56_v2, 0  ;;  %v327_v4 = vld [vmem:[#allocation3] sm:$0x3f]   ;;  %v286_v16 = vld [vmem:[%s493_s4] ss:$0 sm:$0xff]  ;;  %v383_v25 = vmov 0  }
  0x19   :  { %v52_v5 = vld [vmem:[%s490_s1] sm:$0xff]  ;;  %300 = vmatpush3.bf16.msra.mxu0 %v63_v3  ;;  %v116_v8 = vsel %vm114_vm2, %v327_v4, 0  ;;  %326 = vset.pattern.permute.xlu0 %v383_v25  ;;  %v254_v38 = vshrl.u32 %v253_v37, 7  ;;  %v260_v41 = vand.u32 127, %v253_v37  ;;  %vm266_vm6 = vcmask 57344  }
  0x1a   :  { %v50_v6 = vld [vmem:[%s489_s0] sm:$0xff]  ;;  %v53_v7 = vpack.c.bf16 %v52_v5, %v52_v5  ;;  %311 = vmatprep.subr.bf16.mxu0 %v381_v1  ;;  %306 = vmatpush3.bf16.msra.mxu1 %v116_v8 }
  0x1b   :  { %v51_v9 = vpack.c.bf16 %v50_v6, %v50_v6  ;;  %v328_v10 = vld [vmem:[%s494_s5] sm:$0xff]   ;;  %v255_v40 = vsub.s32 0, %v254_v38  ;;  %v263_v43 = vsub.s32 %v260_v41, %v254_v38 }
  0x1c   :  { %302 = vmatmul.mubr.msk.bf16.vlgmr.msra.gmra.mrb[0].mxu0 %vm57_vm3, %v53_v7  ;;  %v287_v26 = vld [vmem:[%s495_s6] ss:$0 sm:$0xff]  ;;  %s384_s6 = smov [#allocation6]  }
  0x1d   :  { %315 = vmatprep.mubr.msk.bf16.mxu0 %vm382_vm0, %v381_v1  ;;  %308 = vmatmul.mubr.msk.bf16.vlgmr.msra.gmra.mrb[0].mxu1 %vm110_vm4, %v51_v9  ;;  %v291_v31 = vld [vmem:[%s496_s7] ss:$0 sm:$0xff]  ;;  %s274_s13 = sshll.u32 %s384_s6, 4  ;;  %s275_s13 = int_to_ptr.vmem [resolvable:$true] %s274_s13 }
  0x1e   :  { %312 = vmatpush3.bf16.msra.mxu0 %v328_v10  ;;  %v247_v36 = vld [vmem:[#allocation2] sm:$0x1]  ;;  %s352_s7 = scalar_lea.vmem %s275_s13, 16  ;;  %s356_s14 = scalar_lea.vmem %s275_s13, 32 }
  0x1f   :  { %313 = vmatprep.subr.bf16.mxu0 %v381_v1  ;;  %p353_p8 = scmp.ne.s32.totalorder %s275_s13, %s352_s7  ;;  %p357_p9 = scmp.lt.s32.totalorder %s275_s13, %s275_s13 }
  0x20   :  { %p358_p10 = scmp.lt.s32.totalorder %s356_s14, %s352_s7 }
  0x22   :  { %314 = vmatpush3.bf16.msra.mxu0 %v329_v11  ;;  %p359_p11 = por %p358_p10, %p357_p9 }
  0x24   :  { %p360_p12 = pnand %p359_p11, %p353_p8 }
  0xef   :  { %v99_v12 = vpop.f32.mrb[0].mxu0 }
  0xf0   :  { %v303_v13 = vpop.f32.mrb[1].mxu0  ;;  %v152_v15 = vpop.f32.mrb[0].mxu1 }
  0xf1   :  { %v102_v14 = vpop.f32.mrb[2].mxu0  ;;  %v153_v17 = vadd.f32 %v152_v15, %v99_v12  ;;  %v309_v19 = vpop.f32.mrb[1].mxu1 }
  0xf2   :  { %v304_v18 = vpop.f32.mrb[3].mxu0  ;;  %v155_v20 = vpop.f32.mrb[2].mxu1 }
  0xf3   :  { %v165_v21 = vadd.f32 %v286_v16, %v153_v17  ;;  %v310_v22 = vpop.f32.mrb[3].mxu1 }
  0xf5   :  { %v166_v23 = vmax.f32 %v165_v21, 0.0 }
  0xf7   :  { %v167_v24 = vpack.c.bf16 %v166_v23, %v166_v23 }
  0xf9   :  { %316 = vmatmul.mubr.msk.bf16.vlgmr.msra.gmra.mrb[4].mxu0 %vm191_vm5, %v167_v24 }
 0x1cc   :  { %v229_v27 = vpop.f32.mrb[4].mxu0 }
 0x1cd   :  { %v230_v28 = vadd.f32 %v287_v26, %v229_v27  ;;  %v317_v29 = vpop.f32.mrb[5].mxu0 }
 0x1ce   :  { %v232_v30 = vpop.f32.mrb[6].mxu0 }
 0x1cf   :  { %v235_v32 = vmax.f32 %v230_v28, 0.0  ;;  %v318_v33 = vpop.f32.mrb[7].mxu0 }
 0x1d1   :  { %v243_v34 = vmul.f32 %v291_v31, %v235_v32 }
 0x1d3   :  { %v244_v35 = vsel %vm191_vm5, %v243_v34, 0.0 }
 0x1d4   :  { %245 = vadd.xlane.f32.xlu0 %v244_v35 }
 0x1ea   :  { %250 = vperm.xlu0 %326, %v247_v36  }
 0x261   :  { %v246_v39 = vpop.xlane.xlu0 %245 }
 0x269   :  { %v251_v42 = vpop.permute.xlu0 %250 }
 0x26a   :  { %v256_v44 = vrot.slane %v251_v42, %v255_v40 }
 0x26c   :  { %v257_v45 = vadd.f32 %v256_v44, %v246_v39 }
 0x26e   :  { %v264_v46 = vrot.slane %v257_v45, %v263_v43 }
 0x270   :  { %267 = vst.msk [vmem:[#allocation6] sm:$0x1] %vm266_vm6, %v264_v46 }
 0x271   :  { %363 = shalt.err (!%p360_p12)
}
 0x272   :  { %s364_s17 = scalar_lea.hbm %s498_s9, 16 }
 0x273   :  { %p365_p13 = scmp.ne.s32.totalorder %s498_s9, %s364_s17  ;;  %p368_p0 = scmp.lt.u32.totalorder %s364_s17, %s498_s9 }
 0x275   :  { %p370_p1 = pnand %p368_p0, %p365_p13 }
 0x277   :  { %373 = shalt.err (!%p370_p1)
}
 0x278   :  { %277 = dma.vmem_to_hbm [thread:$0]  %s275_s13, 16, %s498_s9, [#allocation5]  }
 0x279   :  { %376 = dma.done.wait [#allocation5], 16  }
 0x27a   :  { %377 = vsyncadd [#allocation5], 4294967280 }
 0x27b   :  { %281 = vsyncpa [#allocation4], 1 }
 0x27c   :  { %282 = vsyncpa [#allocation5], 1 }

</bundles_post_ra>
